<compile_context>
chip_gen: v7x
topology: tpu7x:2x2x1
jax: 0.10.0
libtpu: 0.0.40
codegen_flags: <defaults>
</compile_context>

<pallas_src>
import jax
import jax.numpy as jnp
import numpy as np
from jax.experimental import pallas as pl
from jax.experimental.pallas import tpu as pltpu


def _round_up(a, m):
    return (a + m - 1) // m * m


def cnn_kernel(x_ref, w1_ref, shift_ref, m_ref, bl_ref, o_ref):
    # x_ref:     (TB, Cin*W)        bf16
    # w1_ref:    (Cin*W, Cout*W)    bf16   (BN scale folded in)
    # shift_ref: (1, Cout*W)        f32    (conv bias + BN shift)
    # m_ref:     (Cout*W, Cout*Cout) bf16  (filter_linear, block-diagonal over channels)
    # bl_ref:    (1, Cout*Cout)     f32
    # o_ref:     (TB, 3*Cout*Cout)  f32
    # stage 1: 1x1x1 conv + BN + ReLU  (bf16 MXU, f32 accumulate)
    y = jnp.dot(x_ref[...], w1_ref[...], preferred_element_type=jnp.float32)
    y = jnp.maximum(y + shift_ref[...], 0.0).astype(jnp.bfloat16)
    # stage 2: Linear over the spatial-W axis, computed ONCE (not tripled)
    z = jnp.dot(y, m_ref[...], preferred_element_type=jnp.float32) + bl_ref[...]
    z = z.astype(o_ref.dtype)
    # 3x channel concat (conv1==conv2==conv3) = pure duplication -> lane-offset stores
    cc = z.shape[1]
    for c in range(o_ref.shape[1] // cc):
        o_ref[:, c * cc:(c + 1) * cc] = z


@jax.jit
def cnn_forward(x, params):
    w1, b1, gamma, beta, rmean, rvar, wl, bl = params
    N, Cin, D, H, W = x.shape
    Cout = w1.shape[0]
    assert W == wl.shape[1], "forward requires spatial W == 3 * output_channel"

    eps = 1e-5
    scale = gamma / jnp.sqrt(rvar + eps)                 # (Cout,)
    shift = (b1 - rmean) * scale + beta                  # (Cout,)  bias folded into BN shift
    w1s = (w1 * scale[:, None]).T                        # (Cin, Cout)  BN scale folded in

    eye_w = jnp.eye(W, dtype=jnp.float32)
    eye_c = jnp.eye(Cout, dtype=jnp.float32)
    # W1_big[ci*W + w, co*W + w'] = w1s[ci, co] * delta(w, w')
    w1_big = jnp.kron(w1s, eye_w).astype(jnp.bfloat16)   # (Cin*W, Cout*W)
    shift_big = jnp.repeat(shift, W).reshape(1, Cout * W)          # f32
    # M0[co*W + w, co'*Cout + j] = delta(co, co') * wl[j, w]
    m0 = jnp.kron(eye_c, wl.T).astype(jnp.bfloat16)      # (Cout*W, Cout*Cout)
    bl_small = jnp.tile(bl, Cout).reshape(1, Cout * Cout)          # f32

    B = N * H * D
    Kin = Cin * W
    CC = Cout * Cout
    Kout = 3 * CC

    # Fused single pass: NCDHW -> (N,H,D,Cin,W) -> (B, Cin*W) + bf16 cast (one XLA op under jit).
    x_flat = jnp.transpose(x, (0, 3, 2, 1, 4)).reshape(B, Kin).astype(jnp.bfloat16)

    # Block the batch axis: large blocks amortize per-step pipeline overhead, but keep
    # >=2 grid steps when possible so both v7x TensorCores get work.  No jnp.pad: the
    # ragged last block's out-of-bounds output rows are masked by Pallas on writeback.
    half = -(-B // 2)
    TB = min(2048, _round_up(max(half, 8), 8))
    grid = (pl.cdiv(B, TB),)

    z = pl.pallas_call(
        cnn_kernel,
        out_shape=jax.ShapeDtypeStruct((B, Kout), jnp.float32),
        grid_spec=pltpu.PrefetchScalarGridSpec(
            num_scalar_prefetch=0,
            grid=grid,
            in_specs=[
                pl.BlockSpec((TB, Kin), lambda i: (i, 0)),
                pl.BlockSpec((Kin, Cout * W), lambda i: (0, 0)),   # resident weight
                pl.BlockSpec((1, Cout * W), lambda i: (0, 0)),
                pl.BlockSpec((Cout * W, CC), lambda i: (0, 0)),    # resident weight
                pl.BlockSpec((1, CC), lambda i: (0, 0)),
            ],
            out_specs=pl.BlockSpec((TB, Kout), lambda i: (i, 0)),
        ),
        compiler_params=pltpu.CompilerParams(dimension_semantics=("parallel",)),
    )(x_flat, w1_big, shift_big, m0, bl_small)

    # (B, 3*Cout*Cout) -> (N, H, D, 3*Cout, Cout): pure reshape, no transpose/tile pass.
    return z.reshape(N, H, D, 3 * Cout, Cout)


def cnn_reference(x, params):
    """Pure-JAX f32 reference mirroring the PyTorch forward (eval-mode BN)."""
    w1, b1, gamma, beta, rmean, rvar, wl, bl = params
    eps = 1e-5
    y = jnp.einsum('ncdhw,oc->nodhw', x, w1) + b1[None, :, None, None, None]
    y = (y - rmean[None, :, None, None, None]) * \
        (gamma / jnp.sqrt(rvar + eps))[None, :, None, None, None] + \
        beta[None, :, None, None, None]
    y = jnp.maximum(y, 0.0)
    cat = jnp.concatenate([y, y, y], axis=1)             # (N, 3C, D, H, W)
    t = jnp.transpose(cat, (0, 3, 2, 1, 4))              # transpose(1,3) -> (N,H,D,3C,W)
    return jnp.einsum('nhdcw,jw->nhdcj', t, wl) + bl     # Linear over last dim


if __name__ == "__main__":
    key = jax.random.PRNGKey(0)
    stack_channel, output_channel = 4, 8
    N, D, H = 2, 3, 5
    W = 3 * output_channel          # required by filter_linear acting on the W axis

    ks = jax.random.split(key, 9)
    x = jax.random.normal(ks[0], (N, stack_channel, D, H, W), jnp.float32)
    # sw1 Conv3d(kernel_size=1) weight -> (Cout, Cin); bias -> (Cout,)
    w1 = 0.1 * jax.random.normal(ks[1], (output_channel, stack_channel), jnp.float32)
    b1 = 0.1 * jax.random.normal(ks[2], (output_channel,), jnp.float32)
    # BatchNorm3d params / running stats (eval mode)
    gamma = 1.0 + 0.1 * jax.random.normal(ks[3], (output_channel,), jnp.float32)
    beta = 0.1 * jax.random.normal(ks[4], (output_channel,), jnp.float32)
    rmean = 0.1 * jax.random.normal(ks[5], (output_channel,), jnp.float32)
    rvar = 1.0 + 0.1 * jax.random.uniform(ks[6], (output_channel,), jnp.float32)
    # filter_linear: Linear(3*Cout, Cout)
    wl = 0.1 * jax.random.normal(ks[7], (output_channel, 3 * output_channel), jnp.float32)
    bl = 0.1 * jax.random.normal(ks[8], (output_channel,), jnp.float32)
    params = (w1, b1, gamma, beta, rmean, rvar, wl, bl)

    out = jax.block_until_ready(cnn_forward(x, params))
    ref = cnn_reference(x, params)
    assert out.shape == (N, H, D, 3 * output_channel, output_channel), out.shape
    # Tolerance loosened vs v1 because MXU operands are bf16 (f32 accumulation).
    np.testing.assert_allclose(np.asarray(out), np.asarray(ref), rtol=2e-2, atol=2e-2)
    print("KERNEL_OK")
</pallas_src>

<mosaic_0001>
module attributes {stable_mosaic.version = 11 : i64} {
  func.func @cnn_kernel(%arg0: i32, %arg1: memref<16x96xbf16, #tpu.memory_space<vmem>>, %arg2: memref<96x192xbf16, #tpu.memory_space<vmem>>, %arg3: memref<1x192xf32, #tpu.memory_space<vmem>>, %arg4: memref<192x64xbf16, #tpu.memory_space<vmem>>, %arg5: memref<1x64xf32, #tpu.memory_space<vmem>>, %arg6: memref<16x192xf32, #tpu.memory_space<vmem>>) attributes {dimension_semantics = [#tpu.dimension_semantics<parallel>], iteration_bounds = array<i64: 2>, scalar_prefetch = 0 : i64, scratch_operands = 0 : i64, tpu.core_type = #tpu.core_type<tc>, window_params = [{transform_indices = @transform_0, window_bounds = array<i64: 16, 96>}, {pipeline_mode = #tpu.pipeline_mode<synchronous>, transform_indices = @transform_1, window_bounds = array<i64: 96, 192>}, {pipeline_mode = #tpu.pipeline_mode<synchronous>, transform_indices = @transform_2, window_bounds = array<i64: 1, 192>}, {pipeline_mode = #tpu.pipeline_mode<synchronous>, transform_indices = @transform_3, window_bounds = array<i64: 192, 64>}, {pipeline_mode = #tpu.pipeline_mode<synchronous>, transform_indices = @transform_4, window_bounds = array<i64: 1, 64>}, {transform_indices = @transform_5, window_bounds = array<i64: 16, 192>}]} {
    %c0 = arith.constant 0 : index
    %c0_0 = arith.constant 0 : index
    %0 = vector.load %arg1[%c0, %c0_0] : memref<16x96xbf16, #tpu.memory_space<vmem>>, vector<16x96xbf16>
    %c0_1 = arith.constant 0 : index
    %c0_2 = arith.constant 0 : index
    %1 = vector.load %arg2[%c0_1, %c0_2] : memref<96x192xbf16, #tpu.memory_space<vmem>>, vector<96x192xbf16>
    %cst = arith.constant dense<0.000000e+00> : vector<16x192xf32>
    %2 = tpu.matmul %0, %1, %cst {dimension_numbers = #tpu.dot_dimension_numbers<[1], [0], [0], [1], [0, 0, 1, 1], [], []>} : vector<16x96xbf16>, vector<96x192xbf16>, vector<16x192xf32> -> vector<16x192xf32>
    %c0_3 = arith.constant 0 : index
    %c0_4 = arith.constant 0 : index
    %3 = vector.load %arg3[%c0_3, %c0_4] : memref<1x192xf32, #tpu.memory_space<vmem>>, vector<1x192xf32>
    %4 = vector.broadcast %3 : vector<1x192xf32> to vector<16x192xf32>
    %5 = arith.addf %2, %4 : vector<16x192xf32>
    %cst_5 = arith.constant 0.000000e+00 : f32
    %6 = vector.broadcast %cst_5 : f32 to vector<16x192xf32>
    %7 = arith.maximumf %5, %6 : vector<16x192xf32>
    %8 = arith.truncf %7 : vector<16x192xf32> to vector<16x192xbf16>
    %c0_6 = arith.constant 0 : index
    %c0_7 = arith.constant 0 : index
    %9 = vector.load %arg4[%c0_6, %c0_7] : memref<192x64xbf16, #tpu.memory_space<vmem>>, vector<192x64xbf16>
    %cst_8 = arith.constant dense<0.000000e+00> : vector<16x64xf32>
    %10 = tpu.matmul %8, %9, %cst_8 {dimension_numbers = #tpu.dot_dimension_numbers<[1], [0], [0], [1], [0, 0, 1, 1], [], []>} : vector<16x192xbf16>, vector<192x64xbf16>, vector<16x64xf32> -> vector<16x64xf32>
    %c0_9 = arith.constant 0 : index
    %c0_10 = arith.constant 0 : index
    %11 = vector.load %arg5[%c0_9, %c0_10] : memref<1x64xf32, #tpu.memory_space<vmem>>, vector<1x64xf32>
    %12 = vector.broadcast %11 : vector<1x64xf32> to vector<16x64xf32>
    %13 = arith.addf %10, %12 : vector<16x64xf32>
    %c0_11 = arith.constant 0 : index
    %c0_12 = arith.constant 0 : index
    %14 = vector.load %arg6[%c0_11, %c0_12] : memref<16x192xf32, #tpu.memory_space<vmem>>, vector<16x64xf32>
    tpu.vector_store %arg6[%c0_11, %c0_12], %13 {strides = array<i32>} : memref<16x192xf32, #tpu.memory_space<vmem>>, vector<16x64xf32>,
    %c0_13 = arith.constant 0 : index
    %c64 = arith.constant 64 : index
    %15 = vector.load %arg6[%c0_13, %c64] : memref<16x192xf32, #tpu.memory_space<vmem>>, vector<16x64xf32>
    tpu.vector_store %arg6[%c0_13, %c64], %13 {strides = array<i32>} : memref<16x192xf32, #tpu.memory_space<vmem>>, vector<16x64xf32>,
    %c0_14 = arith.constant 0 : index
    %c128 = arith.constant 128 : index
    %16 = vector.load %arg6[%c0_14, %c128] : memref<16x192xf32, #tpu.memory_space<vmem>>, vector<16x64xf32>
    tpu.vector_store %arg6[%c0_14, %c128], %13 {strides = array<i32>} : memref<16x192xf32, #tpu.memory_space<vmem>>, vector<16x64xf32>,
    return
  }
  func.func @transform_0(%arg0: i32) -> (i32, i32) {
    %c0_i32 = arith.constant 0 : i32
    %c0_i32_0 = arith.constant 0 : i32
    return %arg0, %c0_i32 : i32, i32
  }
  func.func @transform_1(%arg0: i32) -> (i32, i32) {
    %c0_i32 = arith.constant 0 : i32
    %c0_i32_0 = arith.constant 0 : i32
    %c0_i32_1 = arith.constant 0 : i32
    return %c0_i32, %c0_i32_0 : i32, i32
  }
  func.func @transform_2(%arg0: i32) -> (i32, i32) {
    %c0_i32 = arith.constant 0 : i32
    %c0_i32_0 = arith.constant 0 : i32
    %c0_i32_1 = arith.constant 0 : i32
    return %c0_i32, %c0_i32_0 : i32, i32
  }
  func.func @transform_3(%arg0: i32) -> (i32, i32) {
    %c0_i32 = arith.constant 0 : i32
    %c0_i32_0 = arith.constant 0 : i32
    %c0_i32_1 = arith.constant 0 : i32
    return %c0_i32, %c0_i32_0 : i32, i32
  }
  func.func @transform_4(%arg0: i32) -> (i32, i32) {
    %c0_i32 = arith.constant 0 : i32
    %c0_i32_0 = arith.constant 0 : i32
    %c0_i32_1 = arith.constant 0 : i32
    return %c0_i32, %c0_i32_0 : i32, i32
  }
  func.func @transform_5(%arg0: i32) -> (i32, i32) {
    %c0_i32 = arith.constant 0 : i32
    %c0_i32_0 = arith.constant 0 : i32
    return %arg0, %c0_i32 : i32, i32
  }
}

</mosaic_0001>

<bundles_post_ra>
// kernel: tile.8
= control target key start
LH: loop header
LB: loop body
LE: loop exit
PB: predicated region body
PF: predicated region fallthrough
CT: control target
= control target key end

     0   :  { %s22_s0 = inlined_call_operand.vmem [shape: f32[8], index: 0, kind: input, shape index: {}]   ;;  %s23_s1 = inlined_call_operand.vmem [shape: f32[8,8], index: 1, kind: output, shape index: {}]  }
   0x1   :  { %v4_v0 = vld [vmem:[%s22_s0] ss:$0 sm:$0xff] }
   0x2   :  { %5 = vst [vmem:[%s23_s1] sm:$0xff] %v4_v0 }

// kernel: tile.9
= control target key start
LH: loop header
LB: loop body
LE: loop exit
PB: predicated region body
PF: predicated region fallthrough
CT: control target
= control target key end

     0   :  { %s67_s10 = smov 56   ;;  %s68_s11 = smov 40   ;;  %vm3_vm0 = vcmask 64512   ;;  %vm9_vm1 = vcmask 523712   ;;  %vm15_vm2 = vcmask 458112   ;;  %vm21_vm3 = vcmask 392512   ;;  %s111_s0 = inlined_call_operand.vmem [shape: f32[8,8], index: 0, kind: input, shape index: {}]   ;;  %s112_s1 = inlined_call_operand.vmem [shape: f32[1,64], index: 1, kind: output, shape index: {}]  }
   0x1   :  { %v53_v0 = vld [vmem:[%s111_s0 + $0x7] sm:$0x1]   ;;  %v55_v1 = vld [vmem:[%s111_s0 + $0x5] sm:$0x1]   ;;  %v54_v2 = vld [vmem:[%s111_s0 + $0x6] sm:$0x1]  }
   0x2   :  { %7 = vrot.lane.b32.xlu0 %v53_v0, %s67_s10  ;;  %19 = vrot.lane.b32.xlu1 %v55_v1, %s68_s11  ;;  %v56_v3 = vld [vmem:[%s111_s0 + $0x4] sm:$0x1]   ;;  %v2_v4 = vld [vmem:[%s111_s0] sm:$0x1]   ;;  %s69_s18 = smov 48   ;;  %s70_s19 = smov 32  }
   0x3   :  { %4 = vst.msk [vmem:[#allocation0] sm:$0x1] %vm3_vm0, %v2_v4   ;;  %v57_v5 = vld [vmem:[%s111_s0 + $0x3] sm:$0x1]   ;;  %v58_v6 = vld [vmem:[%s111_s0 + $0x2] sm:$0x1]  }
   0x4   :  { %s71_s24 = smov 24   ;;  %s72_s25 = smov 16   ;;  %v59_v7 = vld [vmem:[%s111_s0 + $0x1] sm:$0x1]   ;;  %vm27_vm4 = vcmask 326912   ;;  %vm33_vm5 = vcmask 261312  }
   0x5   :  { %s73_s0 = smov 8   ;;  %vm39_vm6 = vcmask 195712   ;;  %vm45_vm7 = vcmask 130112  }
   0x6   :  { %13 = vrot.lane.b32.xlu0 %v54_v2, %s69_s18  ;;  %25 = vrot.lane.b32.xlu1 %v56_v3, %s70_s19 }
   0xa   :  { %31 = vrot.lane.b32.xlu0 %v57_v5, %s71_s24  ;;  %37 = vrot.lane.b32.xlu1 %v58_v6, %s72_s25 }
   0xe   :  { %43 = vrot.lane.b32.xlu0 %v59_v7, %s73_s0 }
  0x74   :  { %v8_v8 = vpop.permute.xlu0 %7   ;;  %v20_v9 = vpop.permute.xlu1 %19  }
  0x75   :  { %10 = vst.msk [vmem:[#allocation0] sm:$0x1] %vm9_vm1, %v8_v8  }
  0x78   :  { %v14_v10 = vpop.permute.xlu0 %13   ;;  %v26_v11 = vpop.permute.xlu1 %25  }
  0x79   :  { %16 = vst.msk [vmem:[#allocation0] sm:$0x1] %vm15_vm2, %v14_v10  }
  0x7a   :  { %22 = vst.msk [vmem:[#allocation0] sm:$0x1] %vm21_vm3, %v20_v9  }
  0x7b   :  { %28 = vst.msk [vmem:[#allocation0] sm:$0x1] %vm27_vm4, %v26_v11  }
  0x7c   :  { %v32_v12 = vpop.permute.xlu0 %31   ;;  %v38_v13 = vpop.permute.xlu1 %37  }
  0x7d   :  { %34 = vst.msk [vmem:[#allocation0] sm:$0x1] %vm33_vm5, %v32_v12  }
  0x7e   :  { %40 = vst.msk [vmem:[#allocation0] sm:$0x1] %vm39_vm6, %v38_v13  }
  0x80   :  { %v44_v14 = vpop.permute.xlu0 %43  }
  0x81   :  { %46 = vst.msk [vmem:[#allocation0] sm:$0x1] %vm45_vm7, %v44_v14  }
  0x88   :  { %v50_v15 = vld [vmem:[#allocation0] sm:$0x1] }
  0x89   :  { %52 = vst [vmem:[%s112_s1] sm:$0x1] %v50_v15 }

// kernel: cnn_forward.1
= control target key start
LH: loop header
LB: loop body
LE: loop exit
PB: predicated region body
PF: predicated region fallthrough
CT: control target
= control target key end

     0   :  { %s718_s18 = smov 0   ;;  %s835_s0 = inlined_call_operand.vmem [shape: bf16[30,96], index: 0, kind: input, shape index: {}]   ;;  %s836_s1 = inlined_call_operand.vmem [shape: bf16[96,192], index: 1, kind: input, shape index: {}]   ;;  %s837_s2 = inlined_call_operand.vmem [shape: f32[1,192], index: 2, kind: input, shape index: {}]   ;;  %s838_s3 = inlined_call_operand.vmem [shape: bf16[192,64], index: 3, kind: input, shape index: {}]   ;;  %s839_s4 = inlined_call_operand.vmem [shape: f32[1,64], index: 4, kind: input, shape index: {}]   ;;  %s840_s5 = inlined_call_operand.vmem [shape: f32[30,192], index: 5, kind: output, shape index: {}]  }
   0x1 LB: > { %s596_s19 = sadd.s32 4294967295, %s684_s18   ;;  %p600_p0 = scmp.ge.s32.totalorder %s684_s18, 1  ;;  %s684_s18 = sphi %s718_s18, %s15_s18  }
   0x2   : > { %p188_p1 = scmp.lt.s32.totalorder %s684_s18, 3 }
   0x4   : > { %p189_p2 = pnand %p600_p0, %p188_p1 }
   0x5   : > { %v647_v0 = vld [vmem:[%s836_s1 + $0x4] ss:$8 sps:$4 sm:$0xff] (!%p189_p2)   ;;  %s601_s22 = sshll.u32 (!%p189_p2), %s596_s19, 1  ;;  %v649_v1 = vld [vmem:[%s836_s1] ss:$8 sps:$4 sm:$0xff] (!%p189_p2)   ;;  %v686_v2 = vmov (!%p189_p2), 0   ;;  %v247_v26 = vlaneseq (!%p189_p2) }
   0x6   : > { %192 = sbr.rel (%p189_p2) target bundleno = 587 (0x24b), region = 40  ;;  %358 = vmatprep.mubr.bf16.mxu0 (!%p189_p2), %v686_v2  ;;  %p218_p3 = scmp.lt.s32.totalorder (!%p189_p2), %s601_s22, 3  ;;  %482 = vmatprep.subr.bf16.mxu1 (!%p189_p2), %v686_v2  ;;  %v650_v3 = vld [vmem:[%s836_s1 + $0x14] ss:$8 sps:$4 sm:$0xff] (!%p189_p2)   ;;  %v652_v4 = vld [vmem:[%s836_s1 + $0x10] ss:$8 sps:$4 sm:$0xff] (!%p189_p2)  }
   0x7   : > { %326 = vmatprep.subr.bf16.mxu0 (!%p189_p2), %v647_v0  ;;  %v653_v5 = vld [vmem:[%s836_s1 + $0x24] ss:$8 sps:$4 sm:$0xff] (!%p189_p2)   ;;  %v655_v6 = vld [vmem:[%s836_s1 + $0x20] ss:$8 sps:$4 sm:$0xff] (!%p189_p2)   ;;  %v656_v7 = vld [vmem:[%s836_s1 + $0x34] ss:$8 sps:$4 sm:$0xff] (!%p189_p2)  }
   0x8   : > { %327 = vmatpush1.bf16.msra.mxu0 (!%p189_p2), %v649_v1  ;;  %v666_v8 = vld [vmem:[%s838_s3] sm:$0xff] (!%p189_p2)   ;;  %v658_v9 = vld [vmem:[%s836_s1 + $0x30] ss:$8 sps:$4 sm:$0xff] (!%p189_p2)   ;;  %v667_v10 = vld [vmem:[%s838_s3 + $0x8] sm:$0xff] (!%p189_p2)   ;;  %vm322_vm0 = vcmask (!%p189_p2), 785408   ;;  %v248_v27 = vshrl.u32 (!%p189_p2), %v247_v26, 7 }
   0x9   : > { %328 = vmatprep.subr.bf16.mxu0 (!%p189_p2), %v650_v3  ;;  %483 = vmatpush1.bf16.msra.mxu1 (!%p189_p2), %v666_v8  ;;  %v659_v11 = vld [vmem:[%s836_s1 + $0x44] ss:$8 sps:$4 sm:$0xff] (!%p189_p2)   ;;  %v661_v12 = vld [vmem:[%s836_s1 + $0x40] ss:$8 sps:$4 sm:$0xff] (!%p189_p2)   ;;  %v668_v13 = vld [vmem:[%s838_s3 + $0x10] sm:$0xff] (!%p189_p2)   ;;  %vm478_vm1 = vcmask (!%p189_p2), 523264  }
   0xa   : > { %484 = vmatprep.subr.bf16.mxu1 (!%p189_p2), %v686_v2  ;;  %v662_v14 = vld [vmem:[%s836_s1 + $0x54] ss:$8 sps:$4 sm:$0xff] (!%p189_p2)   ;;  %v664_v15 = vld [vmem:[%s836_s1 + $0x50] ss:$8 sps:$4 sm:$0xff] (!%p189_p2)   ;;  %v670_v18 = vld [vmem:[%s838_s3 + $0x20] sm:$0xff] (!%p189_p2)   ;;  %v249_v28 = vsub.s32 (!%p189_p2), 0, %v248_v27 }
   0xb   : > { %v669_v16 = vld [vmem:[%s838_s3 + $0x18] sm:$0xff] (!%p189_p2)   ;;  %v671_v19 = vld [vmem:[%s838_s3 + $0x28] sm:$0xff] (!%p189_p2)   ;;  %v672_v20 = vld [vmem:[%s838_s3 + $0x30] sm:$0xff] (!%p189_p2)   ;;  %v253_v30 = vsub.s32 (!%p189_p2), 1, %v248_v27  ;;  %s687_s10 = smov (!%p189_p2), 64   ;;  %vm533_vm2 = vcmask (!%p189_p2), 1048064  }
   0xc   : > { %329 = vmatpush1.bf16.msra.mxu0 (!%p189_p2), %v652_v4  ;;  %v673_v21 = vld [vmem:[%s838_s3 + $0x38] sm:$0xff] (!%p189_p2)   ;;  %v674_v22 = vld [vmem:[%s838_s3 + $0x40] sm:$0xff] (!%p189_p2)   ;;  %v675_v23 = vld [vmem:[%s838_s3 + $0x48] sm:$0xff] (!%p189_p2)  }
   0xd   : > { %s842_s22 = smov (!%p218_p3, %s601_s22), 3  ;;  %330 = vmatprep.subr.bf16.mxu0 %v653_v5  ;;  %485 = vmatpush1.bf16.msra.mxu1 %v667_v10  ;;  %v676_v24 = vld [vmem:[%s838_s3 + $0x50] sm:$0xff]   ;;  %v677_v25 = vld [vmem:[%s838_s3 + $0x58] sm:$0xff]   ;;  %v245_v29 = vld [vmem:[%s837_s2] sm:$0x3] }
   0xe   : > { %s602_s6 = sshll.u32 %s842_s22, 2  ;;  %486 = vmatprep.subr.bf16.mxu1 %v686_v2  ;;  %v250_v31 = vrot.slane %v245_v29, %v249_v28  ;;  %v254_v32 = vrot.slane %v245_v29, %v253_v30  ;;  %s636_s29 = sshll.u32 %s842_s22, 4  ;;  %v620_v47 = vld [vmem:[%s839_s4] ss:$0 sm:$0xff] }
   0xf   : > { %s221_s11 = scalar_lea.vmem %s835_s0, %s602_s6  ;;  %s228_s9 = scalar_lea.vmem %s840_s5, %s636_s29 }
  0x10   : > { %331 = vmatpush1.bf16.msra.mxu0 %v655_v6  ;;  %v665_v17 = vld [vmem:[%s221_s11] sm:$0xff]  }
  0x11   : > { %332 = vmatprep.subr.bf16.mxu0 %v656_v7  ;;  %487 = vmatpush1.bf16.msra.mxu1 %v668_v13 }
  0x12   : > { %488 = vmatprep.subr.bf16.mxu1 %v686_v2 }
  0x14   : > { %333 = vmatpush1.bf16.msra.mxu0 %v658_v9 }
  0x15   : > { %334 = vmatprep.subr.bf16.mxu0 %v659_v11  ;;  %489 = vmatpush1.bf16.msra.mxu1 %v669_v16 }
  0x16   : > { %490 = vmatprep.subr.bf16.mxu1 %v686_v2 }
  0x18   : > { %335 = vmatpush1.bf16.msra.mxu0 %v661_v12 }
  0x19   : > { %336 = vmatprep.subr.bf16.mxu0 %v662_v14  ;;  %491 = vmatpush1.bf16.msra.mxu1 %v670_v18 }
  0x1a   : > { %492 = vmatprep.subr.bf16.mxu1 %v686_v2 }
  0x1c   : > { %337 = vmatpush1.bf16.msra.mxu0 %v664_v15 }
  0x1d   : > { %493 = vmatpush1.bf16.msra.mxu1 %v671_v19 }
  0x1e   : > { %494 = vmatprep.subr.bf16.mxu1 %v686_v2 }
  0x1f   : > { %619 = vmatmul.mubr.msk.bf16.vlgmr.msra.gmra.mrb[0].mxu0 %vm322_vm0, %v665_v17 }
  0x21   : > { %495 = vmatpush1.bf16.msra.mxu1 %v672_v20 }
  0x22   : > { %496 = vmatprep.subr.bf16.mxu1 %v686_v2 }
  0x25   : > { %497 = vmatpush1.bf16.msra.mxu1 %v673_v21 }
  0x26   : > { %498 = vmatprep.subr.bf16.mxu1 %v686_v2 }
  0x29   : > { %499 = vmatpush1.bf16.msra.mxu1 %v674_v22 }
  0x2a   : > { %500 = vmatprep.subr.bf16.mxu1 %v686_v2 }
  0x2d   : > { %501 = vmatpush1.bf16.msra.mxu1 %v675_v23 }
  0x2e   : > { %502 = vmatprep.subr.bf16.mxu1 %v686_v2 }
  0x31   : > { %503 = vmatpush1.bf16.msra.mxu1 %v676_v24 }
  0x32   : > { %504 = vmatprep.subr.bf16.mxu1 %v686_v2 }
  0x35   : > { %505 = vmatpush1.bf16.msra.mxu1 %v677_v25 }
  0xf2   : > { %v360_v33 = vpop.f32.mrb[0].mxu0 }
  0xf3   : > { %v361_v34 = vadd.f32 %v360_v33, %v250_v31  ;;  %v362_v35 = vpop.f32.mrb[1].mxu0 }
  0xf4   : > { %v363_v36 = vadd.f32 %v362_v35, %v254_v32  ;;  %v364_v37 = vpop.f32.mrb[2].mxu0 }
  0xf5   : > { %v365_v38 = vadd.f32 %v364_v37, %v250_v31  ;;  %v366_v39 = vpop.f32.mrb[3].mxu0  ;;  %v369_v41 = vmax.f32 %v361_v34, 0.0 }
  0xf6   : > { %v367_v40 = vadd.f32 %v366_v39, %v254_v32  ;;  %v370_v43 = vmax.f32 %v363_v36, 0.0 }
  0xf7   : > { %v371_v42 = vmax.f32 %v365_v38, 0.0 }
  0xf8   : > { %v372_v44 = vmax.f32 %v367_v40, 0.0 }
  0xf9   : > { %v373_v45 = vpack.c.bf16 %v371_v42, %v369_v41 }
  0xfa   : > { %v374_v46 = vpack.c.bf16 %v372_v44, %v370_v43 }
  0xfc   : > { %633 = vmatprep.mubr.msk.bf16.mxu1 %vm478_vm1, %v374_v46 }
  0xfd   : > { %515 = vmatmul.mubr.bf16.vlgmr.msra.gmra.mrb[0].mxu1 %v373_v45 }
 0x1d0   : > { %v516_v48 = vpop.f32.mrb[0].mxu1 }
 0x1d1   : > { %v517_v49 = vadd.f32 %v620_v47, %v516_v48  ;;  %v518_v50 = vpop.f32.mrb[1].mxu1 }
 0x1d2   : > { %v519_v51 = vpop.f32.mrb[2].mxu1 }
 0x1d3   : > { %523 = vst.msk [vmem:[%s228_s9] sm:$0xff] %vm478_vm1, %v517_v49  ;;  %536 = vst.msk [vmem:[%s228_s9 + $0x8] sm:$0xff] %vm478_vm1, %v517_v49  ;;  %v520_v52 = vadd.f32 %v620_v47, %v519_v51  ;;  %v521_v53 = vpop.f32.mrb[3].mxu1  ;;  %527 = vrot.lane.b32.xlu0 %v517_v49, %s687_s10 }
 0x1d5   : > { %524 = vst.msk [vmem:[%s228_s9 + $0x10] sm:$0xff] %vm478_vm1, %v520_v52  ;;  %537 = vst.msk [vmem:[%s228_s9 + $0x18] sm:$0xff] %vm478_vm1, %v520_v52 }
 0x1d7   : > { %529 = vrot.lane.b32.xlu0 %v520_v52, %s687_s10 }
 0x245   : > { %v528_v54 = vpop.permute.xlu0 %527 }
 0x246   : > { %534 = vst.msk [vmem:[%s228_s9] sm:$0xff] %vm533_vm2, %v528_v54 }
 0x249   : > { %v530_v55 = vpop.permute.xlu0 %529 }
 0x24a   : > { %535 = vst.msk [vmem:[%s228_s9 + $0x10] sm:$0xff] %vm533_vm2, %v530_v55 }
 0x24b PF: > { %s15_s18 = sadd.s32 1, %s684_s18  }
 0x24c   : > { %p12_p4 = scmp.ge.s32.totalorder %s15_s18, 4  }
 0x24e   :  { %14 = sbr.rel (!%p12_p4) target bundleno = 1 (0x1), region = 70 }

</bundles_post_ra>
